<compile_context>
chip_gen: v7x
topology: tpu7x:2x2x1
jax: 0.10.0
libtpu: 0.0.40
codegen_flags: <defaults>
</compile_context>

<pallas_src>
import math
import functools

import jax
import jax.numpy as jnp
from jax.experimental import pallas as pl
from jax.experimental.pallas import tpu as pltpu


# ---------------------------------------------------------------------------
# Physics constants (PendulumDynamics.__init__ defaults: l=1.0, m=1.0)
# ---------------------------------------------------------------------------
_G = 10.0
_M = 1.0
_L = 1.0
_DT = 0.05
_PI = math.pi

_LANE = 128          # lane width -> batch padding granularity
_TR_MAX = 256        # sublane-rows per tile -> 256*128 = 32768 batch elems


def _angle_normalize(x, low=-_PI, high=_PI):
    # (x - low) % (high - low) + low ; jnp.mod has the sign of the divisor,
    # same as torch's `%`, so semantics match exactly.
    return jnp.mod(x - low, high - low) + low


def _round_up(x, m):
    return ((x + m - 1) // m) * m


# ---------------------------------------------------------------------------
# Pallas kernel: one batch tile in (channel, rows, 128) layout
#   in_ref  : (3, tr, 128)  channel 0 = theta, 1 = theta_dot, 2 = u
#   out_ref : (2, tr, 128)  or (5, tr, 128) when return_costs
#             channels: 0 new_theta, 1 new_theta_dot,
#                       2 -costs, 3 -state_costs, 4 -action_costs
# ---------------------------------------------------------------------------
def _pendulum_kernel(in_ref, out_ref, *,
                     action_clamp: bool, normalize: bool, return_costs: bool):
    th = in_ref[0]          # (tr, 128) -- full (8,128) vreg tiles
    thdot = in_ref[1]
    u = in_ref[2]

    if action_clamp:
        u = jnp.clip(u, -2.0, 2.0)
        action_coeff = 0.001
    else:
        action_coeff = 0.1

    # -3g/(2l) * sin(th + pi) == +3g/(2l) * sin(th)  (sign folded into const)
    thetadoubledot = (3.0 * _G / (2.0 * _L)) * jnp.sin(th) \
                     + (3.0 / (_M * _L ** 2)) * u
    newthdot = thdot + thetadoubledot * _DT
    newth = th + newthdot * _DT
    newthdot = jnp.clip(newthdot, -8.0, 8.0)
    if normalize:
        newth = _angle_normalize(newth)

    # Full-tile channel stores (sublane- and lane-dense).
    out_ref[0] = newth
    out_ref[1] = newthdot

    if return_costs:
        th_n = _angle_normalize(th)
        # 0.5 / 20 == 0.025 folded into one constant.
        state_costs = 0.025 * (th_n * th_n + 0.1 * (thdot * thdot))
        action_costs = (0.025 * action_coeff) * (u * u)
        out_ref[2] = -(state_costs + action_costs)
        out_ref[3] = -state_costs
        out_ref[4] = -action_costs


# ---------------------------------------------------------------------------
# Python wrapper (keeps the PyTorch (B, 2)/(B, 1) interface)
# ---------------------------------------------------------------------------
def pendulum_forward(state, action, *, return_costs=False, split_costs=False,
                     normalize=True, action_clamp=True):
    """Pallas implementation of PendulumDynamics.forward.

    state  : (B, 2) float32   action : (B, 1) float32
    """
    state = jnp.asarray(state, jnp.float32)
    action = jnp.asarray(action, jnp.float32)
    B = state.shape[0]

    # Batch -> (rows, 128) so every channel is a dense (8,128)-tileable slab.
    R = pl.cdiv(B, _LANE)
    if R <= _TR_MAX:
        tr, Rp = R, R                     # single tile, full-dim block shape
    else:
        tr = _TR_MAX                      # multiple of 8
        Rp = _round_up(R, tr)
    Bp = Rp * _LANE

    # One combined input slab: channel 0 = theta, 1 = theta_dot, 2 = u.
    inp = jnp.concatenate([state.T, action.T], axis=0)          # (3, B)
    inp = jnp.pad(inp, ((0, 0), (0, Bp - B))).reshape(3, Rp, _LANE)

    n_rows = 5 if return_costs else 2
    kernel = functools.partial(_pendulum_kernel,
                               action_clamp=action_clamp,
                               normalize=normalize,
                               return_costs=return_costs)

    out = pl.pallas_call(
        kernel,
        out_shape=jax.ShapeDtypeStruct((n_rows, Rp, _LANE), jnp.float32),
        grid=(Rp // tr,),
        in_specs=[pl.BlockSpec((3, tr, _LANE), lambda i: (0, i, 0))],
        out_specs=pl.BlockSpec((n_rows, tr, _LANE), lambda i: (0, i, 0)),
        compiler_params=pltpu.CompilerParams(
            dimension_semantics=("parallel",)),
    )(inp)

    out = out.reshape(n_rows, Bp)
    new_state = out[0:2, :B].T                                  # (B, 2)
    if return_costs:
        neg_costs = out[2, :B]                                  # (B,)
        if split_costs:
            return new_state, neg_costs, out[3, :B], out[4, :B]
        return new_state, neg_costs, None
    return new_state


# ---------------------------------------------------------------------------
# Pure-JAX reference (mirrors the PyTorch code) for correctness checks
# ---------------------------------------------------------------------------
def _reference_forward(state, action, normalize=True, action_clamp=True,
                       return_costs=False):
    th = state[:, 0:1]
    thdot = state[:, 1:2]
    u = action
    action_coeff = 0.1
    if action_clamp:
        u = jnp.clip(u, -2.0, 2.0)
        action_coeff = 0.001
    thetadoubledot = -3 * _G / (2 * _L) * jnp.sin(th + _PI) \
                     + 3.0 / (_M * _L ** 2) * u
    newthdot = thdot + thetadoubledot * _DT
    newth = th + newthdot * _DT
    newthdot = jnp.clip(newthdot, -8.0, 8.0)
    if normalize:
        newth = _angle_normalize(newth)
    new_state = jnp.concatenate([newth, newthdot], axis=1)
    if not return_costs:
        return new_state
    state_costs = 0.5 * (_angle_normalize(th) ** 2 + 0.1 * thdot ** 2) / 20.0
    action_costs = 0.5 * action_coeff * u ** 2 / 20.0
    costs = state_costs + action_costs
    return (new_state, -costs[:, 0], -state_costs[:, 0], -action_costs[:, 0])


# ---------------------------------------------------------------------------
# Driver
# ---------------------------------------------------------------------------
if __name__ == "__main__":
    B = 8
    key = jax.random.PRNGKey(0)
    k1, k2 = jax.random.split(key)

    # theta in [-pi, pi], theta_dot in [-8, 8]
    state = jax.random.uniform(k1, (B, 2), jnp.float32, -1.0, 1.0)
    state = state * jnp.array([[math.pi, 8.0]], jnp.float32)
    # action in [-2.5, 2.5]
    action = jax.random.uniform(k2, (B, 1), jnp.float32, -2.5, 2.5)

    # Plain dynamics step (default args of forward)
    new_state = pendulum_forward(state, action)
    new_state = jax.block_until_ready(new_state)

    # With costs (split)
    ns2, costs, scosts, acosts = pendulum_forward(
        state, action, return_costs=True, split_costs=True)
    jax.block_until_ready((ns2, costs, scosts, acosts))

    # Sanity check against pure-JAX reference
    ref_state = _reference_forward(state, action)
    r_ns, r_c, r_sc, r_ac = _reference_forward(state, action, return_costs=True)

    assert new_state.shape == (B, 2)
    assert costs.shape == (B,) and scosts.shape == (B,) and acosts.shape == (B,)
    assert jnp.allclose(new_state, ref_state, atol=1e-5, rtol=1e-5)
    assert jnp.allclose(ns2, r_ns, atol=1e-5, rtol=1e-5)
    assert jnp.allclose(costs, r_c, atol=1e-6, rtol=1e-5)
    assert jnp.allclose(scosts, r_sc, atol=1e-6, rtol=1e-5)
    assert jnp.allclose(acosts, r_ac, atol=1e-6, rtol=1e-5)

    print("KERNEL_OK")
</pallas_src>

<mosaic_0001>
module attributes {stable_mosaic.version = 11 : i64} {
  func.func @_pendulum_kernel(%arg0: i32, %arg1: memref<3x1x128xf32, #tpu.memory_space<vmem>>, %arg2: memref<2x1x128xf32, #tpu.memory_space<vmem>>) attributes {dimension_semantics = [#tpu.dimension_semantics<parallel>], iteration_bounds = array<i64: 1>, scalar_prefetch = 0 : i64, scratch_operands = 0 : i64, tpu.core_type = #tpu.core_type<tc>, window_params = [{transform_indices = @transform_0, window_bounds = array<i64: 3, 1, 128>}, {transform_indices = @transform_1, window_bounds = array<i64: 2, 1, 128>}]} {
    %c0 = arith.constant 0 : index
    %c0_0 = arith.constant 0 : index
    %c0_1 = arith.constant 0 : index
    %0 = vector.load %arg1[%c0, %c0_0, %c0_1] : memref<3x1x128xf32, #tpu.memory_space<vmem>>, vector<1x1x128xf32>
    %1 = vector.shape_cast %0 : vector<1x1x128xf32> to vector<1x128xf32>
    %c1 = arith.constant 1 : index
    %c0_2 = arith.constant 0 : index
    %c0_3 = arith.constant 0 : index
    %2 = vector.load %arg1[%c1, %c0_2, %c0_3] : memref<3x1x128xf32, #tpu.memory_space<vmem>>, vector<1x1x128xf32>
    %3 = vector.shape_cast %2 : vector<1x1x128xf32> to vector<1x128xf32>
    %c2 = arith.constant 2 : index
    %c0_4 = arith.constant 0 : index
    %c0_5 = arith.constant 0 : index
    %4 = vector.load %arg1[%c2, %c0_4, %c0_5] : memref<3x1x128xf32, #tpu.memory_space<vmem>>, vector<1x1x128xf32>
    %5 = vector.shape_cast %4 : vector<1x1x128xf32> to vector<1x128xf32>
    %cst = arith.constant -2.000000e+00 : f32
    %cst_6 = arith.constant 2.000000e+00 : f32
    %6 = vector.broadcast %cst : f32 to vector<1x128xf32>
    %7 = arith.maximumf %6, %5 : vector<1x128xf32>
    %8 = vector.broadcast %cst_6 : f32 to vector<1x128xf32>
    %9 = arith.minimumf %8, %7 : vector<1x128xf32>
    %10 = math.sin %1 : vector<1x128xf32>
    %cst_7 = arith.constant 1.500000e+01 : f32
    %11 = vector.broadcast %cst_7 : f32 to vector<1x128xf32>
    %12 = arith.mulf %11, %10 : vector<1x128xf32>
    %cst_8 = arith.constant 3.000000e+00 : f32
    %13 = vector.broadcast %cst_8 : f32 to vector<1x128xf32>
    %14 = arith.mulf %13, %9 : vector<1x128xf32>
    %15 = arith.addf %12, %14 : vector<1x128xf32>
    %cst_9 = arith.constant 5.000000e-02 : f32
    %16 = vector.broadcast %cst_9 : f32 to vector<1x128xf32>
    %17 = arith.mulf %15, %16 : vector<1x128xf32>
    %18 = arith.addf %3, %17 : vector<1x128xf32>
    %cst_10 = arith.constant 5.000000e-02 : f32
    %19 = vector.broadcast %cst_10 : f32 to vector<1x128xf32>
    %20 = arith.mulf %18, %19 : vector<1x128xf32>
    %21 = arith.addf %1, %20 : vector<1x128xf32>
    %cst_11 = arith.constant -8.000000e+00 : f32
    %cst_12 = arith.constant 8.000000e+00 : f32
    %22 = vector.broadcast %cst_11 : f32 to vector<1x128xf32>
    %23 = arith.maximumf %22, %18 : vector<1x128xf32>
    %24 = vector.broadcast %cst_12 : f32 to vector<1x128xf32>
    %25 = arith.minimumf %24, %23 : vector<1x128xf32>
    %cst_13 = arith.constant -3.14159274 : f32
    %26 = vector.broadcast %cst_13 : f32 to vector<1x128xf32>
    %27 = arith.subf %21, %26 : vector<1x128xf32>
    %cst_14 = arith.constant 6.28318548 : f32
    %28 = vector.broadcast %cst_14 : f32 to vector<1x128xf32>
    %29 = arith.remf %27, %28 : vector<1x128xf32>
    %cst_15 = arith.constant 0.000000e+00 : f32
    %30 = vector.broadcast %cst_15 : f32 to vector<1x128xf32>
    %31 = arith.cmpf one, %29, %30 : vector<1x128xf32>
    %cst_16 = arith.constant 0.000000e+00 : f32
    %32 = vector.broadcast %cst_16 : f32 to vector<1x128xf32>
    %33 = arith.cmpf olt, %29, %32 : vector<1x128xf32>
    %cst_17 = arith.constant 0.000000e+00 : f32
    %34 = arith.cmpf olt, %cst_14, %cst_17 : f32
    %35 = vector.broadcast %34 : i1 to vector<1x128xi1>
    %36 = vector.broadcast %35 : vector<1x128xi1> to vector<1x128xi1>
    %37 = arith.xori %33, %36 : vector<1x128xi1>
    %38 = arith.andi %37, %31 : vector<1x128xi1>
    %39 = vector.broadcast %cst_14 : f32 to vector<1x128xf32>
    %40 = arith.addf %29, %39 : vector<1x128xf32>
    %41 = arith.select %38, %40, %29 : vector<1x128xi1>, vector<1x128xf32>
    %cst_18 = arith.constant -3.14159274 : f32
    %42 = vector.broadcast %cst_18 : f32 to vector<1x128xf32>
    %43 = arith.addf %41, %42 : vector<1x128xf32>
    %c0_19 = arith.constant 0 : index
    %c0_20 = arith.constant 0 : index
    %c0_21 = arith.constant 0 : index
    %44 = vector.load %arg2[%c0_19, %c0_20, %c0_21] : memref<2x1x128xf32, #tpu.memory_space<vmem>>, vector<1x1x128xf32>
    %45 = vector.shape_cast %44 : vector<1x1x128xf32> to vector<1x128xf32>
    %46 = vector.shape_cast %43 : vector<1x128xf32> to vector<1x1x128xf32>
    tpu.vector_store %arg2[%c0_19, %c0_20, %c0_21], %46 {strides = array<i32>} : memref<2x1x128xf32, #tpu.memory_space<vmem>>, vector<1x1x128xf32>,
    %c1_22 = arith.constant 1 : index
    %c0_23 = arith.constant 0 : index
    %c0_24 = arith.constant 0 : index
    %47 = vector.load %arg2[%c1_22, %c0_23, %c0_24] : memref<2x1x128xf32, #tpu.memory_space<vmem>>, vector<1x1x128xf32>
    %48 = vector.shape_cast %47 : vector<1x1x128xf32> to vector<1x128xf32>
    %49 = vector.shape_cast %25 : vector<1x128xf32> to vector<1x1x128xf32>
    tpu.vector_store %arg2[%c1_22, %c0_23, %c0_24], %49 {strides = array<i32>} : memref<2x1x128xf32, #tpu.memory_space<vmem>>, vector<1x1x128xf32>,
    return
  }
  func.func @transform_0(%arg0: i32) -> (i32, i32, i32) {
    %c0_i32 = arith.constant 0 : i32
    %c0_i32_0 = arith.constant 0 : i32
    %c0_i32_1 = arith.constant 0 : i32
    return %c0_i32, %arg0, %c0_i32_0 : i32, i32, i32
  }
  func.func @transform_1(%arg0: i32) -> (i32, i32, i32) {
    %c0_i32 = arith.constant 0 : i32
    %c0_i32_0 = arith.constant 0 : i32
    %c0_i32_1 = arith.constant 0 : i32
    return %c0_i32, %arg0, %c0_i32_0 : i32, i32, i32
  }
}

</mosaic_0001>

<bundles_post_ra>
// kernel: tpu_custom_call.1
= control target key start
LH: loop header
LB: loop body
LE: loop exit
PB: predicated region body
PF: predicated region fallthrough
CT: control target
= control target key end

     0   :  { %6 = vsyncpa [#allocation3], 0  ;;  %s326_s0 = inlined_call_operand.hbm [shape: f32[3,1,128], index: 0, kind: input, shape index: {}]   ;;  %s327_s1 = inlined_call_operand.hbm [shape: f32[2,1,128], index: 1, kind: output, shape index: {}]  }
   0x1   :  { %7 = vsyncpa [#allocation4], 0  ;;  %s254_s6 = smov [#allocation2]   ;;  %s206_s10 = scalar_lea.hbm %s326_s0, 48 }
   0x2   :  { %s13_s7 = sshll.u32 %s254_s6, 4  ;;  %p207_p0 = scmp.ne.s32.totalorder %s326_s0, %s206_s10  ;;  %s14_s7 = int_to_ptr.vmem [resolvable:$true] %s13_s7 }
   0x3   :  { %p210_p1 = scmp.lt.u32.totalorder %s206_s10, %s326_s0 }
   0x5   :  { %p212_p2 = pnand %p210_p1, %p207_p0 }
   0x7   :  { %215 = shalt.err (!%p212_p2)
}
   0x8   :  { %s216_s15 = scalar_lea.vmem %s14_s7, 48  ;;  %s220_s16 = scalar_lea.vmem %s14_s7, 64 }
   0x9   :  { %p217_p3 = scmp.ne.s32.totalorder %s14_s7, %s216_s15  ;;  %p221_p4 = scmp.lt.s32.totalorder %s14_s7, %s14_s7 }
   0xa   :  { %p222_p5 = scmp.lt.s32.totalorder %s220_s16, %s216_s15 }
   0xc   :  { %p223_p6 = por %p222_p5, %p221_p4 }
   0xe   :  { %p224_p7 = pnand %p223_p6, %p217_p3 }
  0x10   :  { %227 = shalt.err (!%p224_p7)
}
  0x11   :  { %s255_s17 = smov 16   ;;  %s256_s18 = smov 1  }
  0x12   :  { %19 = dma.hbm_to_vmem [thread:$0]  %s326_s0, 48, %s14_s7, [#allocation3], %s255_s17, %s255_s17, %s256_s18  }
  0x13   :  { %250 = dma.done.wait [#allocation3], 48  }
  0x14   :  { %251 = vsyncadd [#allocation3], 4294967248  ;;  %v289_v0 = vld [vmem:[#allocation2] sm:$0x1]  ;;  %v257_v12 = vmov 683565275  }
  0x15   :  { %v33_v1 = vand.u32 2139095040, %v289_v0  ;;  %v30_v3 = vand.u32 2147483647, %v289_v0  ;;  %v258_v14 = vmov 2475754826   ;;  %vm32_vm7 = vcmp.lt.s32.totalorder %v289_v0, 0 }
  0x16   :  { %v259_v16 = vmov 2131351028   ;;  %v260_v18 = vmov 2102212464   ;;  %v261_v20 = vmov 920167782   ;;  %vm122_vm12 = vweird.f32 %v289_v0 }
  0x17   :  { %v34_v2 = vshrl.u32 %v33_v1, 23  ;;  %v37_v6 = vand.u32 8388607, %v30_v3  ;;  %v262_v27 = vmov 1326507024   ;;  %s263_s0 = smov [#allocation5]  }
  0x18   :  { %vm31_vm8 = vcmp.le.f32.partialorder %v30_v3, 0.7853982  ;;  %s169_s21 = sshll.u32 %s263_s0, 4  ;;  %s170_s21 = int_to_ptr.vmem [resolvable:$true] %s169_s21 }
  0x19   :  { %v182_v4 = vadd.s32 4294967169, %v34_v2  ;;  %v38_v9 = vor.u32 8388608, %v37_v6  ;;  %s228_s22 = scalar_lea.vmem %s170_s21, 32  ;;  %p233_p9 = scmp.lt.s32.totalorder %s170_s21, %s170_s21 }
  0x1a   :  { %p229_p8 = scmp.ne.s32.totalorder %s170_s21, %s228_s22  ;;  %p234_p10 = scmp.lt.s32.totalorder %s228_s22, %s228_s22 }
  0x1b   :  { %v40_v5 = vadd.s32 1, %v182_v4  ;;  %v78_v29 = vshll.u32 %v38_v9, 8 }
  0x1c   :  { %p235_p11 = por %p234_p10, %p233_p9 }
  0x1d   :  { %vm41_vm0 = vcmp.gt.s32.totalorder %v40_v5, 0 }
  0x1e   :  { %v42_v7 = vsel %vm41_vm0, %v40_v5, 0  ;;  %p236_p12 = pnand %p235_p11, %p229_p8 }
  0x1f   :  { %v44_v8 = vand.u32 31, %v42_v7  ;;  %v43_v10 = vshrl.u32 %v42_v7, 5 }
  0x21   :  { %v45_v11 = vsub.s32 32, %v44_v8  ;;  %v47_v13 = vshll.u32 %v257_v12, %v44_v8  ;;  %v50_v15 = vshll.u32 %v258_v14, %v44_v8  ;;  %v53_v17 = vshll.u32 %v259_v16, %v44_v8 }
  0x22   :  { %v56_v19 = vshll.u32 %v260_v18, %v44_v8  ;;  %v59_v21 = vshll.u32 %v261_v20, %v44_v8  ;;  %vm62_vm1 = vcmp.lt.s32.totalorder %v43_v10, 1  ;;  %vm65_vm2 = vcmp.lt.s32.totalorder %v43_v10, 4 }
  0x23   :  { %v46_v22 = vshrl.u32 %v257_v12, %v45_v11  ;;  %v48_v23 = vshrl.u32 %v258_v14, %v45_v11  ;;  %v51_v24 = vshrl.u32 %v259_v16, %v45_v11  ;;  %v54_v25 = vshrl.u32 %v260_v18, %v45_v11 }
  0x24   :  { %v57_v26 = vshrl.u32 %v261_v20, %v45_v11  ;;  %v60_v28 = vshrl.u32 %v262_v27, %v45_v11  ;;  %vm63_vm3 = vcmp.lt.s32.totalorder %v43_v10, 2  ;;  %vm64_vm4 = vcmp.lt.s32.totalorder %v43_v10, 3 }
  0x25   :  { %v49_v30 = vor.u32 %v48_v23, %v47_v13  ;;  %v52_v31 = vor.u32 %v51_v24, %v50_v15  ;;  %v55_v32 = vor.u32 %v54_v25, %v53_v17 }
  0x26   :  { %v58_v33 = vor.u32 %v57_v26, %v56_v19  ;;  %v61_v34 = vor.u32 %v60_v28, %v59_v21 }
  0x27   :  { %v66_v35 = vsel %vm62_vm1, %v46_v22, %v49_v30  ;;  %v67_v36 = vsel %vm65_vm2, %v55_v32, 2102212464  ;;  %v70_v37 = vsel %vm62_vm1, %v49_v30, %v52_v31  ;;  %v74_v38 = vsel %vm62_vm1, %v52_v31, %v55_v32  ;;  %v27_v22 = vld [vmem:[#allocation2 + $0x2] sm:$0x1] }
  0x28   :  { %v68_v39 = vsel %vm64_vm4, %v52_v31, %v67_v36  ;;  %v71_v40 = vsel %vm65_vm2, %v58_v33, 920167782  ;;  %v75_v41 = vsel %vm65_vm2, %v61_v34, 1326507024  ;;  %v181_v25 = vclamps-f32 %v27_v22, 2.0 }
  0x29   :  { %v72_v42 = vsel %vm64_vm4, %v55_v32, %v71_v40  ;;  %v76_v43 = vsel %vm64_vm4, %v58_v33, %v75_v41  ;;  %v69_v44 = vsel %vm63_vm3, %v66_v35, %v68_v39  ;;  %v25_v34 = vld [vmem:[#allocation2 + $0x1] sm:$0x1] }
  0x2a   :  { %v73_v45 = vsel %vm63_vm3, %v70_v37, %v72_v42  ;;  %v77_v46 = vsel %vm63_vm3, %v74_v38, %v76_v43  ;;  %v85_v51 = vmul.u32 %v78_v29, %v69_v44  ;;  %v135_v30 = vmul.f32 3.0, %v181_v25 }
  0x2b   :  { %v295_v47 = vmul.u32.u64.low %v78_v29, %v77_v46  ;;  %v296_v48 = vmul.u32.u64.high %v78_v29, %v77_v46, %v295_v47  ;;  %v298_v49 = vmul.u32.u64.low %v78_v29, %v73_v45  ;;  %v299_v50 = vmul.u32.u64.high %v78_v29, %v73_v45, %v298_v49 }
  0x2d   :  { %vm87_vm5 = vc.u32 %v296_v48, %v298_v49  ;;  %v88_v52 = vadd.s32 1, %v299_v50  ;;  %v86_v63 = vadd.s32 %v298_v49, %v296_v48 }
  0x2f   :  { %v89_v53 = vsel %vm87_vm5, %v88_v52, %v299_v50 }
  0x30   :  { %v90_v54 = vadd.s32 %v89_v53, %v85_v51 }
  0x32   :  { %v91_v55 = vadd.s32 536870912, %v90_v54 }
  0x34   :  { %v92_v56 = vshrl.u32 %v91_v55, 30 }
  0x36   :  { %v93_v57 = vshll.u32 %v92_v56, 30  ;;  %v116_v13 = vsub.s32 4, %v92_v56 }
  0x38   :  { %v94_v58 = vsub.s32 %v90_v54, %v93_v57  ;;  %v117_v16 = vsel %vm32_vm7, %v116_v13, %v92_v56 }
  0x39   :  { %v119_v19 = vsel %vm31_vm8, 0, %v117_v16 }
  0x3a   :  { %v96_v59 = vsub.s32 0, %v94_v58  ;;  %v123_v20 = vadd.s32 3, %v119_v19 }
  0x3c   :  { %v183_v60 = vmin.u32 %v96_v59, %v94_v58  ;;  %v124_v21 = vand.u32 3, %v123_v20 }
  0x3e   :  { %v98_v61 = vclz %v183_v60  ;;  %vm129_vm9 = vcmp.eq.s32.totalorder %v124_v21, 2  ;;  %vm126_vm10 = vcmp.eq.s32.totalorder %v124_v21, 0  ;;  %vm125_vm11 = vcmp.lt.s32.totalorder %v124_v21, 2 }
  0x40   :  { %v184_v62 = vadd.s32 4294967294, %v98_v61 }
  0x42   :  { %vm185_vm6 = vcmp.lt.s32.totalorder %v184_v62, 0 }
  0x43   :  { %v101_v1 = vsel %vm185_vm6, 0, %v184_v62 }
  0x44   :  { %v102_v2 = vsub.s32 32, %v101_v1  ;;  %v103_v4 = vshll.u32 %v94_v58, %v101_v1  ;;  %v106_v5 = vsub.s32 4294967266, %v101_v1 }
  0x46   :  { %v104_v6 = vshrl.u32 %v86_v63, %v102_v2  ;;  %v107_v7 = vadd.s32 127, %v106_v5 }
  0x48   :  { %v105_v8 = vor.u32 %v104_v6, %v103_v4  ;;  %v108_v9 = vshll.u32 %v107_v7, 23 }
  0x4a   :  { %v109_v10 = vor.u32 4788187, %v108_v9  ;;  %v112_v11 = vcvt.s32.f32 %v105_v8 }
  0x4c   :  { %v110_v12 = vand.u32 2147483647, %v109_v10 }
  0x4e   :  { %v113_v14 = vmul.f32 %v112_v11, %v110_v12 }
  0x50   :  { %v114_v15 = vxor.u32 2147483648, %v113_v14 }
  0x52   :  { %v115_v17 = vsel %vm32_vm7, %v114_v15, %v113_v14 }
  0x53   :  { %v118_v18 = vsel %vm31_vm8, %v289_v0, %v115_v17 }
  0x54   :  { %202 = vcosq.f32 %v118_v18 }
  0x55   :  { %204 = vsinq.f32 %v118_v18 }
  0x5e   :  { %v203_v23 = vpop.eup %202 }
  0x5f   :  { %v205_v24 = vpop.eup %204  ;;  %v130_v26 = vxor.u32 2147483648, %v203_v23 }
  0x60   :  { %v127_v27 = vxor.u32 2147483648, %v205_v24 }
  0x61   :  { %v131_v3 = vsel %vm129_vm9, %v130_v26, %v205_v24 }
  0x62   :  { %v128_v28 = vsel %vm126_vm10, %v203_v23, %v127_v27 }
  0x63   :  { %v132_v29 = vsel %vm125_vm11, %v128_v28, %v131_v3 }
  0x64   :  { %v133_v31 = vsel %vm122_vm12, nan, %v132_v29 }
  0x65   :  { %v134_v32 = vmul.f32 15.0, %v133_v31 }
  0x67   :  { %v136_v33 = vadd.f32 %v135_v30, %v134_v32 }
  0x69   :  { %v137_v35 = vmul.f32 0.05, %v136_v33 }
  0x6b   :  { %v138_v36 = vadd.f32 %v137_v35, %v25_v34 }
  0x6d   :  { %v139_v37 = vmul.f32 0.05, %v138_v36  ;;  %v186_v38 = vclamps-f32 %v138_v36, 8.0 }
  0x6f   :  { %v140_v39 = vadd.f32 %v139_v37, %v289_v0  ;;  %163 = vst [vmem:[#allocation5 + $0x1] sm:$0x1] %v186_v38 }
  0x71   :  { %v187_v40 = vadd.f32 3.1415927, %v140_v39 }
  0x73   :  { %v144_v41 = vand.u32 2147483647, %v187_v40  ;;  %v153_v46 = vand.u32 2147483648, %v187_v40 }
  0x75   :  { %v146_v42 = vmul.f32 0.15915494, %v144_v41 }
  0x77   :  { %v147_v43 = vfloor.f32 %v146_v42 }
  0x79   :  { %v148_v44 = vmul.f32 6.2831855, %v147_v43 }
  0x7b   :  { %v149_v45 = vsub.f32 %v144_v41, %v148_v44 }
  0x7d   :  { %vm150_vm13 = vcmp.eq.f32.partialorder %v149_v45, 6.2831855 }
  0x7e   :  { %v151_v47 = vsel %vm150_vm13, 0.0, %v149_v45 }
  0x7f   :  { %v152_v48 = vand.u32 2147483647, %v151_v47 }
  0x81   :  { %v154_v49 = vor.u32 %v153_v46, %v152_v48 }
  0x83   :  { %vm155_vm14 = vcmp.ne.f32.partialorder %v154_v49, 0.0  ;;  %vm156_vm15 = vcmp.lt.f32.partialorder %v154_v49, 0.0  ;;  %v158_v50 = vadd.f32 6.2831855, %v154_v49 }
  0x84   :  { %vm157_vm0 = vmand %vm156_vm15, %vm155_vm14 }
  0x85   :  { %v159_v51 = vsel %vm157_vm0, %v158_v50, %v154_v49 }
  0x86   :  { %v160_v0 = vadd.f32 -3.1415927, %v159_v51 }
  0x88   :  { %161 = vst [vmem:[#allocation5] sm:$0x1] %v160_v0 }
  0x89   :  { %239 = shalt.err (!%p236_p12)
}
  0x8a   :  { %s240_s25 = scalar_lea.hbm %s327_s1, 32 }
  0x8b   :  { %p241_p13 = scmp.ne.s32.totalorder %s327_s1, %s240_s25  ;;  %p244_p0 = scmp.lt.u32.totalorder %s240_s25, %s327_s1 }
  0x8d   :  { %p246_p1 = pnand %p244_p0, %p241_p13 }
  0x8f   :  { %249 = shalt.err (!%p246_p1)
}
  0x90   :  { %175 = dma.vmem_to_hbm [thread:$0]  %s170_s21, 32, %s327_s1, [#allocation4], %s255_s17, %s255_s17, %s256_s18  }
  0x91   :  { %252 = dma.done.wait [#allocation4], 32  }
  0x92   :  { %253 = vsyncadd [#allocation4], 4294967264 }
  0x93   :  { %179 = vsyncpa [#allocation3], 1 }
  0x94   :  { %180 = vsyncpa [#allocation4], 1 }

</bundles_post_ra>
